<compile_context>
chip_gen: v6e
topology: v6e:2x2x1
jax: 0.10.0
libtpu: 0.0.40
codegen_flags: <defaults>
</compile_context>

<pallas_src>
import functools

import jax
import jax.numpy as jnp
from jax.experimental import pallas as pl
from jax.experimental.pallas import tpu as pltpu


def _round_up(x, m):
    return ((x + m - 1) // m) * m


def _cdiv(a, b):
    return -(-a // b)


def _self_output_kernel(x_ref, res_ref, w_ref, p_ref, o_ref, *, eps):
    # x_ref:   (TM, H) tile of flattened hidden_states (native dtype)
    # res_ref: (TM, H) tile of flattened input_tensor (residual)
    # w_ref:   (H, H)  W^T in [in, out] layout (native dtype), grid-resident
    # p_ref:   (3, H)  f32 params: row 0 = bias, row 1 = gamma, row 2 = beta

    # Dense: x @ W^T. Operands stay in native dtype (bf16 -> full-rate MXU
    # path), accumulation in f32. Standard contraction (lhs dim 1, rhs dim 0).
    h = jnp.dot(x_ref[...], w_ref[...], preferred_element_type=jnp.float32)

    # Dropout: identity at inference.
    # TODO(synk): training-mode dropout (pltpu.prng_random_bits mask) not emitted here.

    params = p_ref[...]
    bias = params[0:1, :]
    gamma = params[1:2, :]
    beta = params[2:3, :]

    # Bias + residual add, all in f32.
    y = h + bias + res_ref[...].astype(jnp.float32)

    # LayerNorm over the hidden (last) axis — single-pass statistics.
    inv_h = 1.0 / y.shape[-1]
    mean = jnp.sum(y, axis=-1, keepdims=True) * inv_h
    msq = jnp.sum(y * y, axis=-1, keepdims=True) * inv_h
    var = jnp.maximum(msq - mean * mean, 0.0)     # guard tiny negative cancellation
    scale = jax.lax.rsqrt(var + eps) * gamma
    o_ref[...] = ((y - mean) * scale + beta).astype(o_ref.dtype)


def _pallas_self_output(x2d, r2d, wt, params, *, tr, grid, eps, vmem_bytes,
                        single_buffer_constants):
    R, H = x2d.shape
    const_mode = {}
    if single_buffer_constants:
        # Constant index_maps -> no need for a second HxH buffer.
        const_mode = dict(pipeline_mode=pl.Buffered(1))

    kernel = functools.partial(_self_output_kernel, eps=eps)
    return pl.pallas_call(
        kernel,
        out_shape=jax.ShapeDtypeStruct((R, H), x2d.dtype),
        grid_spec=pltpu.PrefetchScalarGridSpec(
            num_scalar_prefetch=0,
            grid=(grid,),
            in_specs=[
                pl.BlockSpec((tr, H), lambda i: (i, 0)),              # x tile
                pl.BlockSpec((tr, H), lambda i: (i, 0)),              # residual tile
                pl.BlockSpec((H, H), lambda i: (0, 0), **const_mode),  # W^T (resident)
                pl.BlockSpec((3, H), lambda i: (0, 0), **const_mode),  # bias/gamma/beta
            ],
            out_specs=pl.BlockSpec((tr, H), lambda i: (i, 0)),
        ),
        compiler_params=pltpu.CompilerParams(
            dimension_semantics=("parallel",),
            vmem_limit_bytes=vmem_bytes,
        ),
    )(x2d, r2d, wt, params)


def _pick_tile_rows(R, tile_rows):
    tr = max(8, _round_up(int(tile_rows), 8))
    if R <= tr:
        # Small shapes: split into >= 2 grid steps so both v7x TCs get work.
        tr = max(8, _round_up(_cdiv(R, 2), 8))
    return tr


def _pick_vmem_limit(tr, H, act_bytes, w_bytes):
    stream = tr * H * act_bytes
    need = 3 * 2 * stream            # x, residual, out: double-buffered streams
    need += 2 * H * H * w_bytes      # resident weight (worst case: 2 buffers)
    need += 2 * 3 * H * 4            # packed f32 params
    need += 6 * tr * H * 4           # f32 matmul/LN temporaries (rough)
    need = int(need * 1.25) + (2 << 20)

    phys = 64 << 20                  # conservative default (v7x per-TC VMEM)
    try:
        info = pltpu.get_tpu_info()
        phys = int(getattr(info, "vmem_capacity_bytes", phys) or phys)
    except Exception:
        pass
    cap = int(phys * 0.85)           # leave headroom for Mosaic internals
    return max(16 << 20, min(need, cap))


def bert_self_output(hidden_states, input_tensor, weight, bias, gamma, beta,
                     *, eps=1e-12, tile_rows=512):
    """hidden_states, input_tensor: [B, S, H]; weight: [H, H] (PyTorch [out, in])."""
    B, S, H = hidden_states.shape
    R = B * S

    x2d = hidden_states.reshape(R, H)
    r2d = input_tensor.reshape(R, H)

    # One-time transpose to [in, out]: kernel contracts the MXU-friendly
    # sublane dim of the resident weight (no per-step relayout).
    wt = jnp.transpose(weight)

    # Pack bias / gamma / beta into a single (3, H) f32 block (one DMA).
    params = jnp.concatenate(
        [bias.reshape(1, H), gamma.reshape(1, H), beta.reshape(1, H)], axis=0
    ).astype(jnp.float32)

    tr = _pick_tile_rows(R, tile_rows)
    grid = _cdiv(R, tr)

    vmem_bytes = _pick_vmem_limit(
        tr, H,
        jnp.dtype(hidden_states.dtype).itemsize,
        jnp.dtype(weight.dtype).itemsize,
    )

    call = functools.partial(
        _pallas_self_output, x2d, r2d, wt, params,
        tr=tr, grid=grid, eps=eps, vmem_bytes=vmem_bytes,
    )
    try:
        out2d = call(single_buffer_constants=True)
    except Exception:
        # pipeline_mode=pl.Buffered(1) unsupported -> default double buffering.
        out2d = call(single_buffer_constants=False)

    return out2d.reshape(B, S, H)


def _reference(hidden_states, input_tensor, weight, bias, gamma, beta, eps):
    hs = hidden_states.astype(jnp.float32)
    it = input_tensor.astype(jnp.float32)
    w = weight.astype(jnp.float32)
    y = hs @ w.T + bias.astype(jnp.float32) + it
    mu = y.mean(-1, keepdims=True)
    var = ((y - mu) ** 2).mean(-1, keepdims=True)
    return (y - mu) / jnp.sqrt(var + eps) * gamma.astype(jnp.float32) \
        + beta.astype(jnp.float32)


if __name__ == "__main__":
    eps = 1e-12
    key = jax.random.PRNGKey(0)

    # --- Test 1: small BERT-like config, f32, tight check --------------------
    batch, seq, hidden = 2, 8, 128
    k1, k2, k3, k4 = jax.random.split(key, 4)
    hs = jax.random.normal(k1, (batch, seq, hidden), dtype=jnp.float32)
    it = jax.random.normal(k2, (batch, seq, hidden), dtype=jnp.float32)
    w = jax.random.normal(k3, (hidden, hidden), dtype=jnp.float32) * 0.02
    b = jax.random.normal(k4, (hidden,), dtype=jnp.float32) * 0.02
    g = jnp.ones((hidden,), dtype=jnp.float32)
    be = jnp.zeros((hidden,), dtype=jnp.float32)

    out = bert_self_output(hs, it, w, b, g, be, eps=eps)
    out = jax.block_until_ready(out)
    ref = _reference(hs, it, w, b, g, be, eps)
    assert jnp.allclose(out, ref, atol=1e-4, rtol=1e-4), "f32 mismatch vs reference"

    # --- Test 2: ragged row count (masked partial last block), f32 -----------
    batch2, seq2, hidden2 = 3, 37, 256
    k5, k6, k7, k8 = jax.random.split(jax.random.PRNGKey(1), 4)
    hs2 = jax.random.normal(k5, (batch2, seq2, hidden2), dtype=jnp.float32)
    it2 = jax.random.normal(k6, (batch2, seq2, hidden2), dtype=jnp.float32)
    w2 = jax.random.normal(k7, (hidden2, hidden2), dtype=jnp.float32) * 0.02
    b2 = jax.random.normal(k8, (hidden2,), dtype=jnp.float32) * 0.02
    g2 = jnp.ones((hidden2,), dtype=jnp.float32)
    be2 = jnp.zeros((hidden2,), dtype=jnp.float32)

    out2 = bert_self_output(hs2, it2, w2, b2, g2, be2, eps=eps)
    out2 = jax.block_until_ready(out2)
    ref2 = _reference(hs2, it2, w2, b2, g2, be2, eps)
    assert jnp.allclose(out2, ref2, atol=1e-4, rtol=1e-4), "ragged f32 mismatch"

    # --- Test 3: bf16 activations/weight (MXU fast path), loose check --------
    batch3, seq3, hidden3 = 2, 64, 256
    k9, k10, k11 = jax.random.split(jax.random.PRNGKey(2), 3)
    hs3 = jax.random.normal(k9, (batch3, seq3, hidden3), dtype=jnp.float32)
    it3 = jax.random.normal(k10, (batch3, seq3, hidden3), dtype=jnp.float32)
    w3 = jax.random.normal(k11, (hidden3, hidden3), dtype=jnp.float32) * 0.02
    b3 = jnp.zeros((hidden3,), dtype=jnp.float32)
    g3 = jnp.ones((hidden3,), dtype=jnp.float32)
    be3 = jnp.zeros((hidden3,), dtype=jnp.float32)

    out3 = bert_self_output(hs3.astype(jnp.bfloat16), it3.astype(jnp.bfloat16),
                            w3.astype(jnp.bfloat16), b3, g3, be3, eps=eps)
    out3 = jax.block_until_ready(out3)
    ref3 = _reference(hs3.astype(jnp.bfloat16), it3.astype(jnp.bfloat16),
                      w3.astype(jnp.bfloat16), b3, g3, be3, eps)
    assert bool(jnp.all(jnp.isfinite(out3.astype(jnp.float32)))), "bf16 non-finite"
    assert jnp.allclose(out3.astype(jnp.float32), ref3, atol=0.25, rtol=0.1), \
        "bf16 mismatch vs reference"

    print("KERNEL_OK")
</pallas_src>

<mosaic_0001>
module attributes {stable_mosaic.version = 11 : i64} {
  func.func @_self_output_kernel(%arg0: i32, %arg1: memref<8x128xf32, #tpu.memory_space<vmem>>, %arg2: memref<8x128xf32, #tpu.memory_space<vmem>>, %arg3: memref<128x128xf32, #tpu.memory_space<vmem>>, %arg4: memref<3x128xf32, #tpu.memory_space<vmem>>, %arg5: memref<8x128xf32, #tpu.memory_space<vmem>>) attributes {dimension_semantics = [#tpu.dimension_semantics<parallel>], iteration_bounds = array<i64: 2>, scalar_prefetch = 0 : i64, scratch_operands = 0 : i64, tpu.core_type = #tpu.core_type<tc>, window_params = [{transform_indices = @transform_0, window_bounds = array<i64: 8, 128>}, {transform_indices = @transform_1, window_bounds = array<i64: 8, 128>}, {pipeline_mode = #tpu.pipeline_mode<synchronous>, transform_indices = @transform_2, window_bounds = array<i64: 128, 128>}, {pipeline_mode = #tpu.pipeline_mode<synchronous>, transform_indices = @transform_3, window_bounds = array<i64: 3, 128>}, {transform_indices = @transform_4, window_bounds = array<i64: 8, 128>}]} {
    %c0 = arith.constant 0 : index
    %c0_0 = arith.constant 0 : index
    %0 = vector.load %arg1[%c0, %c0_0] : memref<8x128xf32, #tpu.memory_space<vmem>>, vector<8x128xf32>
    %c0_1 = arith.constant 0 : index
    %c0_2 = arith.constant 0 : index
    %1 = vector.load %arg3[%c0_1, %c0_2] : memref<128x128xf32, #tpu.memory_space<vmem>>, vector<128x128xf32>
    %cst = arith.constant dense<0.000000e+00> : vector<8x128xf32>
    %2 = tpu.matmul %0, %1, %cst {dimension_numbers = #tpu.dot_dimension_numbers<[1], [0], [0], [1], [0, 0, 1, 1], [], []>} : vector<8x128xf32>, vector<128x128xf32>, vector<8x128xf32> -> vector<8x128xf32>
    %c0_3 = arith.constant 0 : index
    %c0_4 = arith.constant 0 : index
    %3 = vector.load %arg4[%c0_3, %c0_4] : memref<3x128xf32, #tpu.memory_space<vmem>>, vector<3x128xf32>
    %4 = vector.extract_strided_slice %3 {offsets = [0, 0], sizes = [1, 128], strides = [1, 1]} : vector<3x128xf32> to vector<1x128xf32>
    %5 = vector.extract_strided_slice %3 {offsets = [1, 0], sizes = [1, 128], strides = [1, 1]} : vector<3x128xf32> to vector<1x128xf32>
    %6 = vector.extract_strided_slice %3 {offsets = [2, 0], sizes = [1, 128], strides = [1, 1]} : vector<3x128xf32> to vector<1x128xf32>
    %7 = vector.broadcast %4 : vector<1x128xf32> to vector<8x128xf32>
    %8 = arith.addf %2, %7 : vector<8x128xf32>
    %c0_5 = arith.constant 0 : index
    %c0_6 = arith.constant 0 : index
    %9 = vector.load %arg2[%c0_5, %c0_6] : memref<8x128xf32, #tpu.memory_space<vmem>>, vector<8x128xf32>
    %10 = arith.addf %8, %9 : vector<8x128xf32>
    %cst_7 = arith.constant dense<0.000000e+00> : vector<8xf32>
    %11 = vector.multi_reduction <add>, %10, %cst_7 [1] : vector<8x128xf32> to vector<8xf32>
    %12 = vector.shape_cast %11 : vector<8xf32> to vector<8x1xf32>
    %cst_8 = arith.constant 7.812500e-03 : f32
    %13 = vector.broadcast %cst_8 : f32 to vector<8x1xf32>
    %14 = arith.mulf %12, %13 : vector<8x1xf32>
    %15 = arith.mulf %10, %10 : vector<8x128xf32>
    %cst_9 = arith.constant dense<0.000000e+00> : vector<8xf32>
    %16 = vector.multi_reduction <add>, %15, %cst_9 [1] : vector<8x128xf32> to vector<8xf32>
    %17 = vector.shape_cast %16 : vector<8xf32> to vector<8x1xf32>
    %cst_10 = arith.constant 7.812500e-03 : f32
    %18 = vector.broadcast %cst_10 : f32 to vector<8x1xf32>
    %19 = arith.mulf %17, %18 : vector<8x1xf32>
    %20 = arith.mulf %14, %14 : vector<8x1xf32>
    %21 = arith.subf %19, %20 : vector<8x1xf32>
    %cst_11 = arith.constant 0.000000e+00 : f32
    %22 = vector.broadcast %cst_11 : f32 to vector<8x1xf32>
    %23 = arith.maximumf %21, %22 : vector<8x1xf32>
    %cst_12 = arith.constant 9.99999996E-13 : f32
    %24 = vector.broadcast %cst_12 : f32 to vector<8x1xf32>
    %25 = arith.addf %23, %24 : vector<8x1xf32>
    %26 = math.rsqrt %25 : vector<8x1xf32>
    %27 = vector.broadcast %26 : vector<8x1xf32> to vector<8x128xf32>
    %28 = vector.broadcast %5 : vector<1x128xf32> to vector<8x128xf32>
    %29 = arith.mulf %27, %28 : vector<8x128xf32>
    %30 = vector.broadcast %14 : vector<8x1xf32> to vector<8x128xf32>
    %31 = arith.subf %10, %30 : vector<8x128xf32>
    %32 = arith.mulf %31, %29 : vector<8x128xf32>
    %33 = vector.broadcast %6 : vector<1x128xf32> to vector<8x128xf32>
    %34 = arith.addf %32, %33 : vector<8x128xf32>
    %c0_13 = arith.constant 0 : index
    %c0_14 = arith.constant 0 : index
    %35 = vector.load %arg5[%c0_13, %c0_14] : memref<8x128xf32, #tpu.memory_space<vmem>>, vector<8x128xf32>
    tpu.vector_store %arg5[%c0_13, %c0_14], %34 {strides = array<i32>} : memref<8x128xf32, #tpu.memory_space<vmem>>, vector<8x128xf32>,
    return
  }
  func.func @transform_0(%arg0: i32) -> (i32, i32) {
    %c0_i32 = arith.constant 0 : i32
    %c0_i32_0 = arith.constant 0 : i32
    return %arg0, %c0_i32 : i32, i32
  }
  func.func @transform_1(%arg0: i32) -> (i32, i32) {
    %c0_i32 = arith.constant 0 : i32
    %c0_i32_0 = arith.constant 0 : i32
    return %arg0, %c0_i32 : i32, i32
  }
  func.func @transform_2(%arg0: i32) -> (i32, i32) {
    %c0_i32 = arith.constant 0 : i32
    %c0_i32_0 = arith.constant 0 : i32
    %c0_i32_1 = arith.constant 0 : i32
    return %c0_i32, %c0_i32_0 : i32, i32
  }
  func.func @transform_3(%arg0: i32) -> (i32, i32) {
    %c0_i32 = arith.constant 0 : i32
    %c0_i32_0 = arith.constant 0 : i32
    %c0_i32_1 = arith.constant 0 : i32
    return %c0_i32, %c0_i32_0 : i32, i32
  }
  func.func @transform_4(%arg0: i32) -> (i32, i32) {
    %c0_i32 = arith.constant 0 : i32
    %c0_i32_0 = arith.constant 0 : i32
    return %arg0, %c0_i32 : i32, i32
  }
}

module attributes {stable_mosaic.version = 11 : i64} {
  func.func @_self_output_kernel(%arg0: i32, %arg1: memref<8x128xf32, #tpu.memory_space<vmem>>, %arg2: memref<8x128xf32, #tpu.memory_space<vmem>>, %arg3: memref<128x128xf32, #tpu.memory_space<vmem>>, %arg4: memref<3x128xf32, #tpu.memory_space<vmem>>, %arg5: memref<8x128xf32, #tpu.memory_space<vmem>>) attributes {dimension_semantics = [#tpu.dimension_semantics<parallel>], iteration_bounds = array<i64: 2>, scalar_prefetch = 0 : i64, scratch_operands = 0 : i64, tpu.core_type = #tpu.core_type<tc>, window_params = [{transform_indices = @transform_0, window_bounds = array<i64: 8, 128>}, {transform_indices = @transform_1, window_bounds = array<i64: 8, 128>}, {pipeline_mode = #tpu.pipeline_mode<synchronous>, transform_indices = @transform_2, window_bounds = array<i64: 128, 128>}, {pipeline_mode = #tpu.pipeline_mode<synchronous>, transform_indices = @transform_3, window_bounds = array<i64: 3, 128>}, {transform_indices = @transform_4, window_bounds = array<i64: 8, 128>}]} {
    %c0 = arith.constant 0 : index
    %c0_0 = arith.constant 0 : index
    %0 = vector.load %arg1[%c0, %c0_0] : memref<8x128xf32, #tpu.memory_space<vmem>>, vector<8x128xf32>
    %c0_1 = arith.constant 0 : index
    %c0_2 = arith.constant 0 : index
    %1 = vector.load %arg3[%c0_1, %c0_2] : memref<128x128xf32, #tpu.memory_space<vmem>>, vector<128x128xf32>
    %cst = arith.constant dense<0.000000e+00> : vector<8x128xf32>
    %2 = tpu.matmul %0, %1, %cst {dimension_numbers = #tpu.dot_dimension_numbers<[1], [0], [0], [1], [0, 0, 1, 1], [], []>} : vector<8x128xf32>, vector<128x128xf32>, vector<8x128xf32> -> vector<8x128xf32>
    %c0_3 = arith.constant 0 : index
    %c0_4 = arith.constant 0 : index
    %3 = vector.load %arg4[%c0_3, %c0_4] : memref<3x128xf32, #tpu.memory_space<vmem>>, vector<3x128xf32>
    %4 = vector.extract_strided_slice %3 {offsets = [0, 0], sizes = [1, 128], strides = [1, 1]} : vector<3x128xf32> to vector<1x128xf32>
    %5 = vector.extract_strided_slice %3 {offsets = [1, 0], sizes = [1, 128], strides = [1, 1]} : vector<3x128xf32> to vector<1x128xf32>
    %6 = vector.extract_strided_slice %3 {offsets = [2, 0], sizes = [1, 128], strides = [1, 1]} : vector<3x128xf32> to vector<1x128xf32>
    %7 = vector.broadcast %4 : vector<1x128xf32> to vector<8x128xf32>
    %8 = arith.addf %2, %7 : vector<8x128xf32>
    %c0_5 = arith.constant 0 : index
    %c0_6 = arith.constant 0 : index
    %9 = vector.load %arg2[%c0_5, %c0_6] : memref<8x128xf32, #tpu.memory_space<vmem>>, vector<8x128xf32>
    %10 = arith.addf %8, %9 : vector<8x128xf32>
    %cst_7 = arith.constant dense<0.000000e+00> : vector<8xf32>
    %11 = vector.multi_reduction <add>, %10, %cst_7 [1] : vector<8x128xf32> to vector<8xf32>
    %12 = vector.shape_cast %11 : vector<8xf32> to vector<8x1xf32>
    %cst_8 = arith.constant 7.812500e-03 : f32
    %13 = vector.broadcast %cst_8 : f32 to vector<8x1xf32>
    %14 = arith.mulf %12, %13 : vector<8x1xf32>
    %15 = arith.mulf %10, %10 : vector<8x128xf32>
    %cst_9 = arith.constant dense<0.000000e+00> : vector<8xf32>
    %16 = vector.multi_reduction <add>, %15, %cst_9 [1] : vector<8x128xf32> to vector<8xf32>
    %17 = vector.shape_cast %16 : vector<8xf32> to vector<8x1xf32>
    %cst_10 = arith.constant 7.812500e-03 : f32
    %18 = vector.broadcast %cst_10 : f32 to vector<8x1xf32>
    %19 = arith.mulf %17, %18 : vector<8x1xf32>
    %20 = arith.mulf %14, %14 : vector<8x1xf32>
    %21 = arith.subf %19, %20 : vector<8x1xf32>
    %cst_11 = arith.constant 0.000000e+00 : f32
    %22 = vector.broadcast %cst_11 : f32 to vector<8x1xf32>
    %23 = arith.maximumf %21, %22 : vector<8x1xf32>
    %cst_12 = arith.constant 9.99999996E-13 : f32
    %24 = vector.broadcast %cst_12 : f32 to vector<8x1xf32>
    %25 = arith.addf %23, %24 : vector<8x1xf32>
    %26 = math.rsqrt %25 : vector<8x1xf32>
    %27 = vector.broadcast %26 : vector<8x1xf32> to vector<8x128xf32>
    %28 = vector.broadcast %5 : vector<1x128xf32> to vector<8x128xf32>
    %29 = arith.mulf %27, %28 : vector<8x128xf32>
    %30 = vector.broadcast %14 : vector<8x1xf32> to vector<8x128xf32>
    %31 = arith.subf %10, %30 : vector<8x128xf32>
    %32 = arith.mulf %31, %29 : vector<8x128xf32>
    %33 = vector.broadcast %6 : vector<1x128xf32> to vector<8x128xf32>
    %34 = arith.addf %32, %33 : vector<8x128xf32>
    %c0_13 = arith.constant 0 : index
    %c0_14 = arith.constant 0 : index
    %35 = vector.load %arg5[%c0_13, %c0_14] : memref<8x128xf32, #tpu.memory_space<vmem>>, vector<8x128xf32>
    tpu.vector_store %arg5[%c0_13, %c0_14], %34 {strides = array<i32>} : memref<8x128xf32, #tpu.memory_space<vmem>>, vector<8x128xf32>,
    return
  }
  func.func @transform_0(%arg0: i32) -> (i32, i32) {
    %c0_i32 = arith.constant 0 : i32
    %c0_i32_0 = arith.constant 0 : i32
    return %arg0, %c0_i32 : i32, i32
  }
  func.func @transform_1(%arg0: i32) -> (i32, i32) {
    %c0_i32 = arith.constant 0 : i32
    %c0_i32_0 = arith.constant 0 : i32
    return %arg0, %c0_i32 : i32, i32
  }
  func.func @transform_2(%arg0: i32) -> (i32, i32) {
    %c0_i32 = arith.constant 0 : i32
    %c0_i32_0 = arith.constant 0 : i32
    %c0_i32_1 = arith.constant 0 : i32
    return %c0_i32, %c0_i32_0 : i32, i32
  }
  func.func @transform_3(%arg0: i32) -> (i32, i32) {
    %c0_i32 = arith.constant 0 : i32
    %c0_i32_0 = arith.constant 0 : i32
    %c0_i32_1 = arith.constant 0 : i32
    return %c0_i32, %c0_i32_0 : i32, i32
  }
  func.func @transform_4(%arg0: i32) -> (i32, i32) {
    %c0_i32 = arith.constant 0 : i32
    %c0_i32_0 = arith.constant 0 : i32
    return %arg0, %c0_i32 : i32, i32
  }
}

</mosaic_0001>

<bundles_post_ra>
// kernel: tpu_custom_call.1
= control target key start
LH: loop header
LB: loop body
LE: loop exit
PB: predicated region body
PF: predicated region fallthrough
CT: control target
= control target key end

     0   :  { %s1030_s0 = inlined_call_operand.hbm [shape: f32[16,128], index: 0, kind: input, shape index: {}]   ;;  %s1031_s1 = inlined_call_operand.hbm [shape: f32[16,128], index: 1, kind: input, shape index: {}]   ;;  %s1032_s2 = inlined_call_operand.hbm [shape: f32[128,128], index: 2, kind: input, shape index: {}]   ;;  %s1033_s3 = inlined_call_operand.vmem [shape: f32[3,128], index: 3, kind: input, shape index: {}]   ;;  %s1034_s4 = inlined_call_operand.hbm [shape: f32[16,128], index: 4, kind: output, shape index: {}]  }
   0x1   :  { %1039 = sst [smem:[#allocation13_spill]] %s1032_s2 }
   0x2   :  { %9 = vsyncpa [#allocation3], 0 }
   0x3   :  { %11 = vsyncpa [#allocation3 + $0x1], 0 }
   0x4   :  { %12 = vsyncpa [#allocation6], 0 }
   0x5   :  { %14 = vsyncpa [#allocation6 + $0x1], 0 }
   0x6   :  { %15 = vsyncpa [#allocation4], 0 }
   0x7   :  { %17 = vsyncpa [#allocation4 + $0x1], 0  ;;  %s825_s15 = smov 0   ;;  %s827_s16 = smov 0  }
   0x8   :  { %s829_s17 = smov 0   ;;  %s831_s18 = smov 0  }
   0x9 LB: > { %s846_s19 = sadd.s32 4294967295, %s790_s18   ;;  %s499_s20 = sadd.s32 4294967294, %s790_s18   ;;  %s790_s18 = sphi %s831_s18, %s1058_s18   ;;  %s786_s17 = sphi %s829_s17, %s1057_s17   ;;  %s782_s16 = sphi %s827_s16, %s1056_s16   ;;  %s778_s15 = sphi %s825_s15, %s1055_s15  }
   0xa   : > { %p43_p0 = scmp.ne.s32.totalorder %s782_s16, %s778_s15  ;;  %p1035_p1 = scmp.eq.s32.totalorder %s846_s19, 0 }
   0xb   : > { %p141_p3 = scmp.eq.s32.totalorder %s499_s20, 1  ;;  %p500_p5 = scmp.ge.s32.totalorder %s790_s18, 1 }
   0xc   : > { %p855_p4 = por %p1035_p1, %p43_p0  ;;  %p148_p7 = scmp.lt.s32.totalorder %s790_s18, 3 }
   0xd   : > { %p860_p6 = por %p141_p3, %p43_p0  ;;  %s792_s24 = smov [#allocation7]  }
   0xe   : > { %s1040_s21 = scalar_select %p855_p4, 1, 0 }
   0xf   : > { %s1041_s22 = scalar_select %p860_p6, 1, 0 }
  0x10   : > { %p865_p8 = pnand %p500_p5, %p148_p7  ;;  %s160_s25 = sshll.u32 %s792_s24, 4  ;;  %s161_s25 = int_to_ptr.vmem [resolvable:$true] %s160_s25 }
  0x11   : > { %s879_s27 = sadd.s32 1, %s790_s18   ;;  %s30_s28 = sadd.s32 1, %s786_s17 }
  0x12   : > { %s1042_s23 = scalar_select %p865_p8, 1, 0 }
  0x13   : > { %p578_p9 = pneg %p865_p8  ;;  %s27_s29 = ssub.s32 %s790_s18, %s879_s27 }
  0x14   : > { %s647_s30 = scalar_lea.vmem %s161_s25, 2048  ;;  %p655_p5 = scmp.lt.s32.totalorder %s161_s25, %s161_s25 }
  0x15   : > { %p874_p11 = pnand %p578_p9, %p1035_p1  ;;  %p648_p13 = scmp.ne.s32.totalorder %s161_s25, %s647_s30 }
  0x16   : > { %p656_p7 = scmp.lt.s32.totalorder %s647_s30, %s647_s30 }
  0x17   : > { %p638_p12 = pneg %p874_p11 }
  0x18   : > { %p657_p10 = por %p656_p7, %p655_p5 }
  0x19   : > { %p650_p0 = pnand %p648_p13, %p638_p12 }
  0x1b   : > { %p651_p3 = pneg %p650_p0 }
  0x1d   : > { %p658_p2 = pnand %p657_p10, %p651_p3 }
  0x1f   : > { %661 = shalt.err (!%p658_p2)
}
  0x20   : > { %s793_s5 = smov 128   ;;  %s794_s6 = smov 8  }
  0x21   : > { %s1044_s2 = sld [smem:[#allocation13_spill]]  ;;  %p28_p9 = scmp.eq.s32.totalorder %s27_s29, 0 }
  0x22   : > { %p37_p12 = scmp.ne.s32.totalorder %s786_s17, %s782_s16  ;;  %p38_p10 = scmp.eq.s32.totalorder %s790_s18, 0 }
  0x23   : > { %p594_p2 = scmp.lt.s32.totalorder %s790_s18, 2  ;;  %p1045_p0 = scmp.eq.s32.totalorder %s846_s19, 1 }
  0x24   : > { %s896_s9 = scalar_select %p28_p9, %s786_s17, %s30_s28  }
  0x25   : > { %p39_p13 = por %p38_p10, %p37_p12  ;;  %p900_p3 = por %p1045_p0, %p37_p12 }
  0x26   : > { %s177_s11 = sand.u32 1, %s786_s17   ;;  %s504_s12 = sshll.u32 %s790_s18, 7 }
  0x27   : > { %581 = dma.hbm_to_vmem [thread:$0]  (!%p874_p11), %s1044_s2, 2048, %s161_s25, [#allocation6], %s793_s5, %s793_s5, %s794_s6  }
  0x28   : > { %s1046_s10 = scalar_select %p900_p3, 1, 0 }
  0x29   : > { %s906_s13 = sshll.u32 %s177_s11, 3  ;;  %s911_s24 = scalar_lea.hbm %s1030_s0, %s504_s12 }
  0x2a   : > { %s181_s25 = scalar_lea.vmem [#allocation2], %s906_s13  ;;  %p914_p11 = pnand %p594_p2, %p39_p13 }
  0x2b   : > { %s188_s26 = sshll.u32 %s181_s25, 4  ;;  %s921_s5 = scalar_lea.hbm %s1031_s1, %s504_s12  ;;  %s189_s26 = int_to_ptr.vmem [resolvable:$true] %s188_s26 }
  0x2c   : > { %s178_s6 = scalar_lea.sflag [#allocation3], %s177_s11  ;;  %s662_s7 = scalar_lea.hbm %s911_s24, 128 }
  0x2d   : > { %p663_p5 = scmp.ne.s32.totalorder %s911_s24, %s662_s7  ;;  %p664_p7 = pneg %p914_p11 }
  0x2e   : > { %s667_s20 = scalar_lea.hbm %s1030_s0, 256  ;;  %p668_p10 = scmp.lt.s32.totalorder %s911_s24, %s1030_s0 }
  0x2f   : > { %p665_p9 = pnand %p664_p7, %p663_p5  ;;  %p669_p2 = scmp.lt.s32.totalorder %s667_s20, %s662_s7 }
  0x31   : > { %p666_p12 = pneg %p665_p9  ;;  %p670_p13 = por %p669_p2, %p668_p10 }
  0x33   : > { %p671_p0 = pnand %p670_p13, %p666_p12 }
  0x35   : > { %674 = shalt.err (!%p671_p0)
}
  0x36   : > { %s675_s11 = scalar_lea.vmem %s189_s26, 128  ;;  %s795_s12 = smov [#allocation2]  }
  0x37   : > { %p676_p1 = scmp.ne.s32.totalorder %s189_s26, %s675_s11  ;;  %s680_s29 = sshll.u32 %s795_s12, 4  ;;  %s681_s29 = int_to_ptr.vmem [resolvable:$false] %s680_s29 }
  0x38   : > { %s682_s30 = scalar_lea.vmem %s681_s29, 256  ;;  %p683_p9 = scmp.lt.s32.totalorder %s189_s26, %s681_s29 }
  0x39   : > { %p678_p6 = pnand %p676_p1, %p664_p7  ;;  %p684_p3 = scmp.lt.s32.totalorder %s682_s30, %s675_s11 }
  0x3b   : > { %p679_p5 = pneg %p678_p6  ;;  %p685_p4 = por %p684_p3, %p683_p9 }
  0x3d   : > { %p686_p8 = pnand %p685_p4, %p679_p5 }
  0x3f   : > { %689 = shalt.err (!%p686_p8)
}
  0x40   : > { %585 = dma.hbm_to_vmem [thread:$0]  (!%p914_p11), %s911_s24, 128, %s189_s26, %s178_s6  }
  0x41   : > { %s195_s2 = sand.u32 1, %s790_s18   ;;  %s199_s7 = scalar_lea.vmem [#allocation5], %s906_s13 }
  0x42   : > { %s206_s8 = sshll.u32 %s199_s7, 4  ;;  %s196_s14 = scalar_lea.sflag [#allocation6], %s195_s2  ;;  %s207_s8 = int_to_ptr.vmem [resolvable:$true] %s206_s8 }
  0x43   : > { %s690_s20 = scalar_lea.hbm %s921_s5, 128  ;;  %s695_s12 = scalar_lea.hbm %s1031_s1, 256 }
  0x44   : > { %p691_p1 = scmp.ne.s32.totalorder %s921_s5, %s690_s20  ;;  %p696_p8 = scmp.lt.s32.totalorder %s921_s5, %s1031_s1 }
  0x45   : > { %p697_p3 = scmp.lt.s32.totalorder %s695_s12, %s690_s20 }
  0x46   : > { %p693_p4 = pnand %p691_p1, %p664_p7 }
  0x47   : > { %p698_p12 = por %p697_p3, %p696_p8 }
  0x48   : > { %p694_p6 = pneg %p693_p4 }
  0x4a   : > { %p699_p10 = pnand %p698_p12, %p694_p6 }
  0x4c   : > { %702 = shalt.err (!%p699_p10)
}
  0x4d   : > { %s703_s13 = scalar_lea.vmem %s207_s8, 128  ;;  %s796_s24 = smov [#allocation5]  }
  0x4e   : > { %p704_p2 = scmp.ne.s32.totalorder %s207_s8, %s703_s13  ;;  %s708_s26 = sshll.u32 %s796_s24, 4  ;;  %s709_s26 = int_to_ptr.vmem [resolvable:$false] %s708_s26 }
  0x4f   : > { %s710_s6 = scalar_lea.vmem %s709_s26, 256  ;;  %p711_p5 = scmp.lt.s32.totalorder %s207_s8, %s709_s26 }
  0x50   : > { %p706_p13 = pnand %p704_p2, %p664_p7  ;;  %p712_p9 = scmp.lt.s32.totalorder %s710_s6, %s703_s13 }
  0x52   : > { %p707_p0 = pneg %p706_p13  ;;  %p713_p1 = por %p712_p9, %p711_p5 }
  0x54   : > { %p714_p4 = pnand %p713_p1, %p707_p0 }
  0x56   : > { %717 = shalt.err (!%p714_p4)
}
  0x57   : > { %588 = dma.hbm_to_vmem [thread:$0]  (!%p914_p11), %s921_s5, 128, %s207_s8, %s196_s14  }
  0x58   : > { %p1048_p6 = scmp.ne.s32.totalorder %s1042_s23, 0 }
  0x59   : > { %s966_s2 = sand.u32 (!%p1048_p6), 1, %s782_s16   ;;  %p1049_p7 = scmp.ne.s32.totalorder (!%p1048_p6), %s1040_s21, 0 }
  0x5a   : > { %215 = sbr.rel (%p1048_p6) target bundleno = 515 (0x203), region = 36  ;;  %s969_s7 = sshll.u32 (!%p1048_p6), %s966_s2, 3 }
  0x5b   : > { %s218_s20 = scalar_lea.sflag (!%p1048_p6), [#allocation3], %s966_s2  ;;  %s221_s25 = scalar_lea.vmem (!%p1048_p6), [#allocation2], %s969_s7 }
  0x5f   : > { %761 = dma.done.wait (%p1049_p7), %s218_s20, 128  }
  0x60   : > { %763 = vsyncadd (%p1049_p7), %s218_s20, 4294967168  ;;  %s226_s23 = sand.u32 1, %s846_s19   ;;  %s230_s5 = scalar_lea.vmem [#allocation5], %s969_s7 }
  0x61   : > { %s227_s28 = scalar_lea.sflag [#allocation6], %s226_s23 }
  0x62   : > { %765 = dma.done.wait (%p1049_p7), %s227_s28, 128  }
  0x63   : > { %767 = vsyncadd (%p1049_p7), %s227_s28, 4294967168  ;;  %p1050_p11 = scmp.eq.s32.totalorder %s846_s19, 0 }
  0x65   : > { %769 = dma.done.wait (%p1050_p11), [#allocation6], 2048   ;;  %p1051_p8 = pmov %p1050_p11 }
  0x66   : > { %v797_v0 = vmov 0.0   ;;  %vm798_vm0 = vmmov 0   ;;  %v280_v1 = vld [vmem:[#allocation7 + $0x78] sm:$0xff]  ;;  %v279_v2 = vld [vmem:[#allocation7 + $0x70] sm:$0xff]  ;;  %v278_v3 = vld [vmem:[#allocation7 + $0x68] sm:$0xff]  ;;  %v282_v18 = vlaneseq  ;;  %s513_s14 = sshll.u32 %s846_s19, 7 }
  0x67   : > { %771 = vsyncadd (%p1051_p8), [#allocation6], 4294965248  ;;  %533 = vmatprep.subr.mxu0 %v797_v0  ;;  %565 = vmatprep.mubr.msk.f32.mxu0 %vm798_vm0, %v797_v0  ;;  %v277_v4 = vld [vmem:[#allocation7 + $0x60] sm:$0xff]  ;;  %v276_v5 = vld [vmem:[#allocation7 + $0x58] sm:$0xff]  ;;  %s263_s11 = scalar_lea.vmem [#allocation8], %s969_s7  ;;  %s395_s13 = scalar_lea.hbm %s1034_s4, %s513_s14 }
  0x68   : > { %534 = vmatpush3.msra.mxu0 %v280_v1  ;;  %v275_v6 = vld [vmem:[#allocation7 + $0x50] sm:$0xff]  ;;  %v274_v7 = vld [vmem:[#allocation7 + $0x48] sm:$0xff]  ;;  %v273_v8 = vld [vmem:[#allocation7 + $0x40] sm:$0xff]  ;;  %v283_v19 = vshrl.u32 %v282_v18, 7  ;;  %s397_s12 = sshll.u32 %s263_s11, 4  ;;  %s384_s24 = scalar_lea.sflag [#allocation4], %s966_s2  ;;  %s398_s12 = int_to_ptr.vmem [resolvable:$true] %s397_s12 }
  0x69   : > { %535 = vmatprep.subr.mxu0 %v797_v0  ;;  %v272_v9 = vld [vmem:[#allocation7 + $0x38] sm:$0xff]  ;;  %v271_v10 = vld [vmem:[#allocation7 + $0x30] sm:$0xff]  ;;  %v270_v11 = vld [vmem:[#allocation7 + $0x28] sm:$0xff]  ;;  %s718_s26 = scalar_lea.vmem %s398_s12, 128  ;;  %p1052_p12 = scmp.ne.s32.totalorder %s1046_s10, 0 }
  0x6a   : > { %536 = vmatpush3.msra.mxu0 %v279_v2  ;;  %v269_v12 = vld [vmem:[#allocation7 + $0x20] sm:$0xff]  ;;  %v268_v13 = vld [vmem:[#allocation7 + $0x18] sm:$0xff]  ;;  %v267_v14 = vld [vmem:[#allocation7 + $0x10] sm:$0xff]  ;;  %v284_v20 = vsub.s32 0, %v283_v19  ;;  %v372_v37 = vsub.s32 1, %v283_v19  ;;  %v379_v39 = vsub.s32 2, %v283_v19  ;;  %p719_p3 = scmp.ne.s32.totalorder %s398_s12, %s718_s26 }
  0x6b   : > { %537 = vmatprep.subr.mxu0 %v797_v0  ;;  %v266_v15 = vld [vmem:[#allocation7 + $0x8] sm:$0xff]  ;;  %v265_v16 = vld [vmem:[#allocation7] sm:$0xff]  ;;  %v356_v24 = vld [vmem:[%s230_s5] sm:$0xff]  ;;  %s799_s6 = smov [#allocation8]  }
  0x6c   : > { %538 = vmatpush3.msra.mxu0 %v278_v3  ;;  %v264_v17 = vld [vmem:[%s221_s25] sm:$0xff]  ;;  %p720_p10 = pnand %p719_p3, %p1052_p12  ;;  %s722_s20 = sshll.u32 %s799_s6, 4  ;;  %s723_s20 = int_to_ptr.vmem [resolvable:$false] %s722_s20 }
  0x6d   : > { %539 = vmatprep.subr.mxu0 %v797_v0  ;;  %v281_v21 = vld [vmem:[%s1033_s3] sm:$0x7]  ;;  %s724_s19 = scalar_lea.vmem %s723_s20, 256  ;;  %p725_p13 = scmp.lt.s32.totalorder %s398_s12, %s723_s20 }
  0x6e   : > { %540 = vmatpush3.msra.mxu0 %v277_v4  ;;  %v285_v22 = vrot.slane %v281_v21, %v284_v20  ;;  %v373_v38 = vrot.slane %v281_v21, %v372_v37  ;;  %v380_v41 = vrot.slane %v281_v21, %v379_v39  ;;  %p721_p2 = pneg %p720_p10  ;;  %p726_p0 = scmp.lt.s32.totalorder %s724_s19, %s718_s26 }
  0x6f   : > { %541 = vmatprep.subr.mxu0 %v797_v0 }
  0x70   : > { %542 = vmatpush3.msra.mxu0 %v276_v5  ;;  %p727_p5 = por %p726_p0, %p725_p13 }
  0x71   : > { %543 = vmatprep.subr.mxu0 %v797_v0 }
  0x72   : > { %544 = vmatpush3.msra.mxu0 %v275_v6  ;;  %p728_p9 = pnand %p727_p5, %p721_p2 }
  0x73   : > { %545 = vmatprep.subr.mxu0 %v797_v0 }
  0x74   : > { %546 = vmatpush3.msra.mxu0 %v274_v7 }
  0x75   : > { %547 = vmatprep.subr.mxu0 %v797_v0 }
  0x76   : > { %548 = vmatpush3.msra.mxu0 %v273_v8 }
  0x77   : > { %549 = vmatprep.subr.mxu0 %v797_v0 }
  0x78   : > { %550 = vmatpush3.msra.mxu0 %v272_v9 }
  0x79   : > { %551 = vmatprep.subr.mxu0 %v797_v0 }
  0x7a   : > { %552 = vmatpush3.msra.mxu0 %v271_v10 }
  0x7b   : > { %553 = vmatprep.subr.mxu0 %v797_v0 }
  0x7c   : > { %554 = vmatpush3.msra.mxu0 %v270_v11 }
  0x7d   : > { %555 = vmatprep.subr.mxu0 %v797_v0 }
  0x7e   : > { %556 = vmatpush3.msra.mxu0 %v269_v12 }
  0x7f   : > { %557 = vmatprep.subr.mxu0 %v797_v0 }
  0x80   : > { %558 = vmatpush3.msra.mxu0 %v268_v13 }
  0x81   : > { %559 = vmatprep.subr.mxu0 %v797_v0 }
  0x82   : > { %560 = vmatpush3.msra.mxu0 %v267_v14 }
  0x83   : > { %561 = vmatprep.subr.mxu0 %v797_v0 }
  0x84   : > { %562 = vmatpush3.msra.mxu0 %v266_v15 }
  0x85   : > { %563 = vmatprep.subr.mxu0 %v797_v0 }
  0x86   : > { %564 = vmatpush3.msra.mxu0 %v265_v16 }
  0x87   : > { %566 = vmatmul.mubr.f32.vlgmr.msra.gmra.mxu0 %v264_v17 }
 0x147   : > { %v352_v23 = vpop.f32.mrf.mxu0 }
 0x148   : > { %v353_v25 = vadd.f32 %v352_v23, %v285_v22 }
 0x149   : > { %v567_v26 = vpop.f32.mrf.mxu0 }
 0x14a   : > { %v357_v27 = vadd.f32 %v356_v24, %v353_v25 }
 0x14c   : > { %358 = vadd.xlane.f32.xlu0 %v357_v27  ;;  %v361_v28 = vmul.f32 %v357_v27, %v357_v27 }
 0x150   : > { %362 = vadd.xlane.f32.xlu0 %v361_v28 }
 0x1d5   : > { %v359_v29 = vpop.xlane.xlu0 %358 }
 0x1d6   : > { %v360_v30 = vmul.f32 0.0078125, %v359_v29 }
 0x1d8   : > { %v365_v32 = vmul.f32 %v360_v30, %v360_v30  ;;  %v375_v42 = vsub.f32 %v357_v27, %v360_v30 }
 0x1d9   : > { %v363_v31 = vpop.xlane.xlu0 %362 }
 0x1da   : > { %v364_v33 = vmul.f32 0.0078125, %v363_v31 }
 0x1dc   : > { %v366_v34 = vsub.f32 %v364_v33, %v365_v32 }
 0x1de   : > { %v367_v35 = vmax.f32 %v366_v34, 0.0 }
 0x1e0   : > { %v368_v36 = vadd.f32 1e-12, %v367_v35 }
 0x1e2   : > { %634 = vrsqrt.f32 %v368_v36 }
 0x1ef   : > { %v635_v40 = vpop.eup %634 }
 0x1f0   : > { %v374_v43 = vmul.f32 %v635_v40, %v373_v38 }
 0x1f2   : > { %v376_v44 = vmul.f32 %v375_v42, %v374_v43 }
 0x1f4   : > { %v381_v45 = vadd.f32 %v380_v41, %v376_v44 }
 0x1f6   : > { %382 = vst [vmem:[%s263_s11] sm:$0xff] %v381_v45 }
 0x1f7   : > { %731 = shalt.err (!%p728_p9)
}
 0x1f8   : > { %s732_s7 = scalar_lea.hbm %s395_s13, 128  ;;  %s736_s23 = scalar_lea.hbm %s1034_s4, 256 }
 0x1f9   : > { %p733_p1 = scmp.ne.s32.totalorder %s395_s13, %s732_s7  ;;  %p737_p7 = scmp.lt.s32.totalorder %s395_s13, %s1034_s4 }
 0x1fa   : > { %p738_p11 = scmp.lt.s32.totalorder %s736_s23, %s732_s7 }
 0x1fb   : > { %p734_p4 = pnand %p733_p1, %p1052_p12 }
 0x1fc   : > { %p739_p8 = por %p738_p11, %p737_p7 }
 0x1fd   : > { %p735_p6 = pneg %p734_p4 }
 0x1ff   : > { %p740_p3 = pnand %p739_p8, %p735_p6 }
 0x201   : > { %743 = shalt.err (!%p740_p3)
}
 0x202   : > { %576 = dma.vmem_to_hbm [thread:$0]  (%p1052_p12), %s398_s12, 128, %s395_s13, %s384_s24  }
 0x203 PF: > { %s409_s21 = sand.u32 1, %s778_s15   ;;  %p1053_p10 = scmp.ne.s32.totalorder %s1041_s22, 0 }
 0x204   : > { %p1054_p2 = scmp.ge.s32.totalorder %s790_s18, 2  ;;  %s410_s8 = scalar_lea.sflag [#allocation4], %s409_s21 }
 0x206   : > { %p590_p13 = pnand %p1054_p2, %p1053_p10 }
 0x208   : > { %p591_p0 = pneg %p590_p13 }
 0x20a   : > { %773 = dma.done.wait (%p591_p0), %s410_s8, 128  }
 0x20b   : > { %775 = vsyncadd (%p591_p0), %s410_s8, 4294967168  ;;  %p20_p5 = scmp.ge.s32.totalorder %s879_s27, 4   ;;  %s1055_s15 = smov %s782_s16 }
 0x20c   : > { %s1056_s16 = smov %s786_s17  ;;  %s1057_s17 = smov %s896_s9 }
 0x20d   : > { %s1058_s18 = smov %s879_s27  ;;  %22 = sbr.rel (!%p20_p5) target bundleno = 9 (0x9), region = 98 }
 0x212   :  { %415 = vsyncpa [#allocation3], 1 }
 0x213   :  { %417 = vsyncpa [#allocation3 + $0x1], 1 }
 0x214   :  { %418 = vsyncpa [#allocation6], 1 }
 0x215   :  { %420 = vsyncpa [#allocation6 + $0x1], 1 }
 0x216   :  { %421 = vsyncpa [#allocation4], 1 }
 0x217   :  { %423 = vsyncpa [#allocation4 + $0x1], 1 }

// kernel: tpu_custom_call.1
= control target key start
LH: loop header
LB: loop body
LE: loop exit
PB: predicated region body
PF: predicated region fallthrough
CT: control target
= control target key end

     0   :  { %s1030_s0 = inlined_call_operand.hbm [shape: f32[16,128], index: 0, kind: input, shape index: {}]   ;;  %s1031_s1 = inlined_call_operand.hbm [shape: f32[16,128], index: 1, kind: input, shape index: {}]   ;;  %s1032_s2 = inlined_call_operand.hbm [shape: f32[128,128], index: 2, kind: input, shape index: {}]   ;;  %s1033_s3 = inlined_call_operand.vmem [shape: f32[3,128], index: 3, kind: input, shape index: {}]   ;;  %s1034_s4 = inlined_call_operand.hbm [shape: f32[16,128], index: 4, kind: output, shape index: {}]  }
   0x1   :  { %1039 = sst [smem:[#allocation13_spill]] %s1032_s2 }
   0x2   :  { %9 = vsyncpa [#allocation3], 0 }
   0x3   :  { %11 = vsyncpa [#allocation3 + $0x1], 0 }
   0x4   :  { %12 = vsyncpa [#allocation6], 0 }
   0x5   :  { %14 = vsyncpa [#allocation6 + $0x1], 0 }
   0x6   :  { %15 = vsyncpa [#allocation4], 0 }
   0x7   :  { %17 = vsyncpa [#allocation4 + $0x1], 0  ;;  %s825_s15 = smov 0   ;;  %s827_s16 = smov 0  }
   0x8   :  { %s829_s17 = smov 0   ;;  %s831_s18 = smov 0  }
   0x9 LB: > { %s846_s19 = sadd.s32 4294967295, %s790_s18   ;;  %s499_s20 = sadd.s32 4294967294, %s790_s18   ;;  %s790_s18 = sphi %s831_s18, %s1058_s18   ;;  %s786_s17 = sphi %s829_s17, %s1057_s17   ;;  %s782_s16 = sphi %s827_s16, %s1056_s16   ;;  %s778_s15 = sphi %s825_s15, %s1055_s15  }
   0xa   : > { %p43_p0 = scmp.ne.s32.totalorder %s782_s16, %s778_s15  ;;  %p1035_p1 = scmp.eq.s32.totalorder %s846_s19, 0 }
   0xb   : > { %p141_p3 = scmp.eq.s32.totalorder %s499_s20, 1  ;;  %p500_p5 = scmp.ge.s32.totalorder %s790_s18, 1 }
   0xc   : > { %p855_p4 = por %p1035_p1, %p43_p0  ;;  %p148_p7 = scmp.lt.s32.totalorder %s790_s18, 3 }
   0xd   : > { %p860_p6 = por %p141_p3, %p43_p0  ;;  %s792_s24 = smov [#allocation7]  }
   0xe   : > { %s1040_s21 = scalar_select %p855_p4, 1, 0 }
   0xf   : > { %s1041_s22 = scalar_select %p860_p6, 1, 0 }
  0x10   : > { %p865_p8 = pnand %p500_p5, %p148_p7  ;;  %s160_s25 = sshll.u32 %s792_s24, 4  ;;  %s161_s25 = int_to_ptr.vmem [resolvable:$true] %s160_s25 }
  0x11   : > { %s879_s27 = sadd.s32 1, %s790_s18   ;;  %s30_s28 = sadd.s32 1, %s786_s17 }
  0x12   : > { %s1042_s23 = scalar_select %p865_p8, 1, 0 }
  0x13   : > { %p578_p9 = pneg %p865_p8  ;;  %s27_s29 = ssub.s32 %s790_s18, %s879_s27 }
  0x14   : > { %s647_s30 = scalar_lea.vmem %s161_s25, 2048  ;;  %p655_p5 = scmp.lt.s32.totalorder %s161_s25, %s161_s25 }
  0x15   : > { %p874_p11 = pnand %p578_p9, %p1035_p1  ;;  %p648_p13 = scmp.ne.s32.totalorder %s161_s25, %s647_s30 }
  0x16   : > { %p656_p7 = scmp.lt.s32.totalorder %s647_s30, %s647_s30 }
  0x17   : > { %p638_p12 = pneg %p874_p11 }
  0x18   : > { %p657_p10 = por %p656_p7, %p655_p5 }
  0x19   : > { %p650_p0 = pnand %p648_p13, %p638_p12 }
  0x1b   : > { %p651_p3 = pneg %p650_p0 }
  0x1d   : > { %p658_p2 = pnand %p657_p10, %p651_p3 }
  0x1f   : > { %661 = shalt.err (!%p658_p2)
}
  0x20   : > { %s793_s5 = smov 128   ;;  %s794_s6 = smov 8  }
  0x21   : > { %s1044_s2 = sld [smem:[#allocation13_spill]]  ;;  %p28_p9 = scmp.eq.s32.totalorder %s27_s29, 0 }
  0x22   : > { %p37_p12 = scmp.ne.s32.totalorder %s786_s17, %s782_s16  ;;  %p38_p10 = scmp.eq.s32.totalorder %s790_s18, 0 }
  0x23   : > { %p594_p2 = scmp.lt.s32.totalorder %s790_s18, 2  ;;  %p1045_p0 = scmp.eq.s32.totalorder %s846_s19, 1 }
  0x24   : > { %s896_s9 = scalar_select %p28_p9, %s786_s17, %s30_s28  }
  0x25   : > { %p39_p13 = por %p38_p10, %p37_p12  ;;  %p900_p3 = por %p1045_p0, %p37_p12 }
  0x26   : > { %s177_s11 = sand.u32 1, %s786_s17   ;;  %s504_s12 = sshll.u32 %s790_s18, 7 }
  0x27   : > { %581 = dma.hbm_to_vmem [thread:$0]  (!%p874_p11), %s1044_s2, 2048, %s161_s25, [#allocation6], %s793_s5, %s793_s5, %s794_s6  }
  0x28   : > { %s1046_s10 = scalar_select %p900_p3, 1, 0 }
  0x29   : > { %s906_s13 = sshll.u32 %s177_s11, 3  ;;  %s911_s24 = scalar_lea.hbm %s1030_s0, %s504_s12 }
  0x2a   : > { %s181_s25 = scalar_lea.vmem [#allocation2], %s906_s13  ;;  %p914_p11 = pnand %p594_p2, %p39_p13 }
  0x2b   : > { %s188_s26 = sshll.u32 %s181_s25, 4  ;;  %s921_s5 = scalar_lea.hbm %s1031_s1, %s504_s12  ;;  %s189_s26 = int_to_ptr.vmem [resolvable:$true] %s188_s26 }
  0x2c   : > { %s178_s6 = scalar_lea.sflag [#allocation3], %s177_s11  ;;  %s662_s7 = scalar_lea.hbm %s911_s24, 128 }
  0x2d   : > { %p663_p5 = scmp.ne.s32.totalorder %s911_s24, %s662_s7  ;;  %p664_p7 = pneg %p914_p11 }
  0x2e   : > { %s667_s20 = scalar_lea.hbm %s1030_s0, 256  ;;  %p668_p10 = scmp.lt.s32.totalorder %s911_s24, %s1030_s0 }
  0x2f   : > { %p665_p9 = pnand %p664_p7, %p663_p5  ;;  %p669_p2 = scmp.lt.s32.totalorder %s667_s20, %s662_s7 }
  0x31   : > { %p666_p12 = pneg %p665_p9  ;;  %p670_p13 = por %p669_p2, %p668_p10 }
  0x33   : > { %p671_p0 = pnand %p670_p13, %p666_p12 }
  0x35   : > { %674 = shalt.err (!%p671_p0)
}
  0x36   : > { %s675_s11 = scalar_lea.vmem %s189_s26, 128  ;;  %s795_s12 = smov [#allocation2]  }
  0x37   : > { %p676_p1 = scmp.ne.s32.totalorder %s189_s26, %s675_s11  ;;  %s680_s29 = sshll.u32 %s795_s12, 4  ;;  %s681_s29 = int_to_ptr.vmem [resolvable:$false] %s680_s29 }
  0x38   : > { %s682_s30 = scalar_lea.vmem %s681_s29, 256  ;;  %p683_p9 = scmp.lt.s32.totalorder %s189_s26, %s681_s29 }
  0x39   : > { %p678_p6 = pnand %p676_p1, %p664_p7  ;;  %p684_p3 = scmp.lt.s32.totalorder %s682_s30, %s675_s11 }
  0x3b   : > { %p679_p5 = pneg %p678_p6  ;;  %p685_p4 = por %p684_p3, %p683_p9 }
  0x3d   : > { %p686_p8 = pnand %p685_p4, %p679_p5 }
  0x3f   : > { %689 = shalt.err (!%p686_p8)
}
  0x40   : > { %585 = dma.hbm_to_vmem [thread:$0]  (!%p914_p11), %s911_s24, 128, %s189_s26, %s178_s6  }
  0x41   : > { %s195_s2 = sand.u32 1, %s790_s18   ;;  %s199_s7 = scalar_lea.vmem [#allocation5], %s906_s13 }
  0x42   : > { %s206_s8 = sshll.u32 %s199_s7, 4  ;;  %s196_s14 = scalar_lea.sflag [#allocation6], %s195_s2  ;;  %s207_s8 = int_to_ptr.vmem [resolvable:$true] %s206_s8 }
  0x43   : > { %s690_s20 = scalar_lea.hbm %s921_s5, 128  ;;  %s695_s12 = scalar_lea.hbm %s1031_s1, 256 }
  0x44   : > { %p691_p1 = scmp.ne.s32.totalorder %s921_s5, %s690_s20  ;;  %p696_p8 = scmp.lt.s32.totalorder %s921_s5, %s1031_s1 }
  0x45   : > { %p697_p3 = scmp.lt.s32.totalorder %s695_s12, %s690_s20 }
  0x46   : > { %p693_p4 = pnand %p691_p1, %p664_p7 }
  0x47   : > { %p698_p12 = por %p697_p3, %p696_p8 }
  0x48   : > { %p694_p6 = pneg %p693_p4 }
  0x4a   : > { %p699_p10 = pnand %p698_p12, %p694_p6 }
  0x4c   : > { %702 = shalt.err (!%p699_p10)
}
  0x4d   : > { %s703_s13 = scalar_lea.vmem %s207_s8, 128  ;;  %s796_s24 = smov [#allocation5]  }
  0x4e   : > { %p704_p2 = scmp.ne.s32.totalorder %s207_s8, %s703_s13  ;;  %s708_s26 = sshll.u32 %s796_s24, 4  ;;  %s709_s26 = int_to_ptr.vmem [resolvable:$false] %s708_s26 }
  0x4f   : > { %s710_s6 = scalar_lea.vmem %s709_s26, 256  ;;  %p711_p5 = scmp.lt.s32.totalorder %s207_s8, %s709_s26 }
  0x50   : > { %p706_p13 = pnand %p704_p2, %p664_p7  ;;  %p712_p9 = scmp.lt.s32.totalorder %s710_s6, %s703_s13 }
  0x52   : > { %p707_p0 = pneg %p706_p13  ;;  %p713_p1 = por %p712_p9, %p711_p5 }
  0x54   : > { %p714_p4 = pnand %p713_p1, %p707_p0 }
  0x56   : > { %717 = shalt.err (!%p714_p4)
}
  0x57   : > { %588 = dma.hbm_to_vmem [thread:$0]  (!%p914_p11), %s921_s5, 128, %s207_s8, %s196_s14  }
  0x58   : > { %p1048_p6 = scmp.ne.s32.totalorder %s1042_s23, 0 }
  0x59   : > { %s966_s2 = sand.u32 (!%p1048_p6), 1, %s782_s16   ;;  %p1049_p7 = scmp.ne.s32.totalorder (!%p1048_p6), %s1040_s21, 0 }
  0x5a   : > { %215 = sbr.rel (%p1048_p6) target bundleno = 515 (0x203), region = 36  ;;  %s969_s7 = sshll.u32 (!%p1048_p6), %s966_s2, 3 }
  0x5b   : > { %s218_s20 = scalar_lea.sflag (!%p1048_p6), [#allocation3], %s966_s2  ;;  %s221_s25 = scalar_lea.vmem (!%p1048_p6), [#allocation2], %s969_s7 }
  0x5f   : > { %761 = dma.done.wait (%p1049_p7), %s218_s20, 128  }
  0x60   : > { %763 = vsyncadd (%p1049_p7), %s218_s20, 4294967168  ;;  %s226_s23 = sand.u32 1, %s846_s19   ;;  %s230_s5 = scalar_lea.vmem [#allocation5], %s969_s7 }
  0x61   : > { %s227_s28 = scalar_lea.sflag [#allocation6], %s226_s23 }
  0x62   : > { %765 = dma.done.wait (%p1049_p7), %s227_s28, 128  }
  0x63   : > { %767 = vsyncadd (%p1049_p7), %s227_s28, 4294967168  ;;  %p1050_p11 = scmp.eq.s32.totalorder %s846_s19, 0 }
  0x65   : > { %769 = dma.done.wait (%p1050_p11), [#allocation6], 2048   ;;  %p1051_p8 = pmov %p1050_p11 }
  0x66   : > { %v797_v0 = vmov 0.0   ;;  %vm798_vm0 = vmmov 0   ;;  %v280_v1 = vld [vmem:[#allocation7 + $0x78] sm:$0xff]  ;;  %v279_v2 = vld [vmem:[#allocation7 + $0x70] sm:$0xff]  ;;  %v278_v3 = vld [vmem:[#allocation7 + $0x68] sm:$0xff]  ;;  %v282_v18 = vlaneseq  ;;  %s513_s14 = sshll.u32 %s846_s19, 7 }
  0x67   : > { %771 = vsyncadd (%p1051_p8), [#allocation6], 4294965248  ;;  %533 = vmatprep.subr.mxu0 %v797_v0  ;;  %565 = vmatprep.mubr.msk.f32.mxu0 %vm798_vm0, %v797_v0  ;;  %v277_v4 = vld [vmem:[#allocation7 + $0x60] sm:$0xff]  ;;  %v276_v5 = vld [vmem:[#allocation7 + $0x58] sm:$0xff]  ;;  %s263_s11 = scalar_lea.vmem [#allocation8], %s969_s7  ;;  %s395_s13 = scalar_lea.hbm %s1034_s4, %s513_s14 }
  0x68   : > { %534 = vmatpush3.msra.mxu0 %v280_v1  ;;  %v275_v6 = vld [vmem:[#allocation7 + $0x50] sm:$0xff]  ;;  %v274_v7 = vld [vmem:[#allocation7 + $0x48] sm:$0xff]  ;;  %v273_v8 = vld [vmem:[#allocation7 + $0x40] sm:$0xff]  ;;  %v283_v19 = vshrl.u32 %v282_v18, 7  ;;  %s397_s12 = sshll.u32 %s263_s11, 4  ;;  %s384_s24 = scalar_lea.sflag [#allocation4], %s966_s2  ;;  %s398_s12 = int_to_ptr.vmem [resolvable:$true] %s397_s12 }
  0x69   : > { %535 = vmatprep.subr.mxu0 %v797_v0  ;;  %v272_v9 = vld [vmem:[#allocation7 + $0x38] sm:$0xff]  ;;  %v271_v10 = vld [vmem:[#allocation7 + $0x30] sm:$0xff]  ;;  %v270_v11 = vld [vmem:[#allocation7 + $0x28] sm:$0xff]  ;;  %s718_s26 = scalar_lea.vmem %s398_s12, 128  ;;  %p1052_p12 = scmp.ne.s32.totalorder %s1046_s10, 0 }
  0x6a   : > { %536 = vmatpush3.msra.mxu0 %v279_v2  ;;  %v269_v12 = vld [vmem:[#allocation7 + $0x20] sm:$0xff]  ;;  %v268_v13 = vld [vmem:[#allocation7 + $0x18] sm:$0xff]  ;;  %v267_v14 = vld [vmem:[#allocation7 + $0x10] sm:$0xff]  ;;  %v284_v20 = vsub.s32 0, %v283_v19  ;;  %v372_v37 = vsub.s32 1, %v283_v19  ;;  %v379_v39 = vsub.s32 2, %v283_v19  ;;  %p719_p3 = scmp.ne.s32.totalorder %s398_s12, %s718_s26 }
  0x6b   : > { %537 = vmatprep.subr.mxu0 %v797_v0  ;;  %v266_v15 = vld [vmem:[#allocation7 + $0x8] sm:$0xff]  ;;  %v265_v16 = vld [vmem:[#allocation7] sm:$0xff]  ;;  %v356_v24 = vld [vmem:[%s230_s5] sm:$0xff]  ;;  %s799_s6 = smov [#allocation8]  }
  0x6c   : > { %538 = vmatpush3.msra.mxu0 %v278_v3  ;;  %v264_v17 = vld [vmem:[%s221_s25] sm:$0xff]  ;;  %p720_p10 = pnand %p719_p3, %p1052_p12  ;;  %s722_s20 = sshll.u32 %s799_s6, 4  ;;  %s723_s20 = int_to_ptr.vmem [resolvable:$false] %s722_s20 }
  0x6d   : > { %539 = vmatprep.subr.mxu0 %v797_v0  ;;  %v281_v21 = vld [vmem:[%s1033_s3] sm:$0x7]  ;;  %s724_s19 = scalar_lea.vmem %s723_s20, 256  ;;  %p725_p13 = scmp.lt.s32.totalorder %s398_s12, %s723_s20 }
  0x6e   : > { %540 = vmatpush3.msra.mxu0 %v277_v4  ;;  %v285_v22 = vrot.slane %v281_v21, %v284_v20  ;;  %v373_v38 = vrot.slane %v281_v21, %v372_v37  ;;  %v380_v41 = vrot.slane %v281_v21, %v379_v39  ;;  %p721_p2 = pneg %p720_p10  ;;  %p726_p0 = scmp.lt.s32.totalorder %s724_s19, %s718_s26 }
  0x6f   : > { %541 = vmatprep.subr.mxu0 %v797_v0 }
  0x70   : > { %542 = vmatpush3.msra.mxu0 %v276_v5  ;;  %p727_p5 = por %p726_p0, %p725_p13 }
  0x71   : > { %543 = vmatprep.subr.mxu0 %v797_v0 }
  0x72   : > { %544 = vmatpush3.msra.mxu0 %v275_v6  ;;  %p728_p9 = pnand %p727_p5, %p721_p2 }
  0x73   : > { %545 = vmatprep.subr.mxu0 %v797_v0 }
  0x74   : > { %546 = vmatpush3.msra.mxu0 %v274_v7 }
  0x75   : > { %547 = vmatprep.subr.mxu0 %v797_v0 }
  0x76   : > { %548 = vmatpush3.msra.mxu0 %v273_v8 }
  0x77   : > { %549 = vmatprep.subr.mxu0 %v797_v0 }
  0x78   : > { %550 = vmatpush3.msra.mxu0 %v272_v9 }
  0x79   : > { %551 = vmatprep.subr.mxu0 %v797_v0 }
  0x7a   : > { %552 = vmatpush3.msra.mxu0 %v271_v10 }
  0x7b   : > { %553 = vmatprep.subr.mxu0 %v797_v0 }
  0x7c   : > { %554 = vmatpush3.msra.mxu0 %v270_v11 }
  0x7d   : > { %555 = vmatprep.subr.mxu0 %v797_v0 }
  0x7e   : > { %556 = vmatpush3.msra.mxu0 %v269_v12 }
  0x7f   : > { %557 = vmatprep.subr.mxu0 %v797_v0 }
  0x80   : > { %558 = vmatpush3.msra.mxu0 %v268_v13 }
  0x81   : > { %559 = vmatprep.subr.mxu0 %v797_v0 }
  0x82   : > { %560 = vmatpush3.msra.mxu0 %v267_v14 }
  0x83   : > { %561 = vmatprep.subr.mxu0 %v797_v0 }
  0x84   : > { %562 = vmatpush3.msra.mxu0 %v266_v15 }
  0x85   : > { %563 = vmatprep.subr.mxu0 %v797_v0 }
  0x86   : > { %564 = vmatpush3.msra.mxu0 %v265_v16 }
  0x87   : > { %566 = vmatmul.mubr.f32.vlgmr.msra.gmra.mxu0 %v264_v17 }
 0x147   : > { %v352_v23 = vpop.f32.mrf.mxu0 }
 0x148   : > { %v353_v25 = vadd.f32 %v352_v23, %v285_v22 }
 0x149   : > { %v567_v26 = vpop.f32.mrf.mxu0 }
 0x14a   : > { %v357_v27 = vadd.f32 %v356_v24, %v353_v25 }
 0x14c   : > { %358 = vadd.xlane.f32.xlu0 %v357_v27  ;;  %v361_v28 = vmul.f32 %v357_v27, %v357_v27 }
 0x150   : > { %362 = vadd.xlane.f32.xlu0 %v361_v28 }
 0x1d5   : > { %v359_v29 = vpop.xlane.xlu0 %358 }
 0x1d6   : > { %v360_v30 = vmul.f32 0.0078125, %v359_v29 }
 0x1d8   : > { %v365_v32 = vmul.f32 %v360_v30, %v360_v30  ;;  %v375_v42 = vsub.f32 %v357_v27, %v360_v30 }
 0x1d9   : > { %v363_v31 = vpop.xlane.xlu0 %362 }
 0x1da   : > { %v364_v33 = vmul.f32 0.0078125, %v363_v31 }
 0x1dc   : > { %v366_v34 = vsub.f32 %v364_v33, %v365_v32 }
 0x1de   : > { %v367_v35 = vmax.f32 %v366_v34, 0.0 }
 0x1e0   : > { %v368_v36 = vadd.f32 1e-12, %v367_v35 }
 0x1e2   : > { %634 = vrsqrt.f32 %v368_v36 }
 0x1ef   : > { %v635_v40 = vpop.eup %634 }
 0x1f0   : > { %v374_v43 = vmul.f32 %v635_v40, %v373_v38 }
 0x1f2   : > { %v376_v44 = vmul.f32 %v375_v42, %v374_v43 }
 0x1f4   : > { %v381_v45 = vadd.f32 %v380_v41, %v376_v44 }
 0x1f6   : > { %382 = vst [vmem:[%s263_s11] sm:$0xff] %v381_v45 }
 0x1f7   : > { %731 = shalt.err (!%p728_p9)
}
 0x1f8   : > { %s732_s7 = scalar_lea.hbm %s395_s13, 128  ;;  %s736_s23 = scalar_lea.hbm %s1034_s4, 256 }
 0x1f9   : > { %p733_p1 = scmp.ne.s32.totalorder %s395_s13, %s732_s7  ;;  %p737_p7 = scmp.lt.s32.totalorder %s395_s13, %s1034_s4 }
 0x1fa   : > { %p738_p11 = scmp.lt.s32.totalorder %s736_s23, %s732_s7 }
 0x1fb   : > { %p734_p4 = pnand %p733_p1, %p1052_p12 }
 0x1fc   : > { %p739_p8 = por %p738_p11, %p737_p7 }
 0x1fd   : > { %p735_p6 = pneg %p734_p4 }
 0x1ff   : > { %p740_p3 = pnand %p739_p8, %p735_p6 }
 0x201   : > { %743 = shalt.err (!%p740_p3)
}
 0x202   : > { %576 = dma.vmem_to_hbm [thread:$0]  (%p1052_p12), %s398_s12, 128, %s395_s13, %s384_s24  }
 0x203 PF: > { %s409_s21 = sand.u32 1, %s778_s15   ;;  %p1053_p10 = scmp.ne.s32.totalorder %s1041_s22, 0 }
 0x204   : > { %p1054_p2 = scmp.ge.s32.totalorder %s790_s18, 2  ;;  %s410_s8 = scalar_lea.sflag [#allocation4], %s409_s21 }
 0x206   : > { %p590_p13 = pnand %p1054_p2, %p1053_p10 }
 0x208   : > { %p591_p0 = pneg %p590_p13 }
 0x20a   : > { %773 = dma.done.wait (%p591_p0), %s410_s8, 128  }
 0x20b   : > { %775 = vsyncadd (%p591_p0), %s410_s8, 4294967168  ;;  %p20_p5 = scmp.ge.s32.totalorder %s879_s27, 4   ;;  %s1055_s15 = smov %s782_s16 }
 0x20c   : > { %s1056_s16 = smov %s786_s17  ;;  %s1057_s17 = smov %s896_s9 }
 0x20d   : > { %s1058_s18 = smov %s879_s27  ;;  %22 = sbr.rel (!%p20_p5) target bundleno = 9 (0x9), region = 98 }
 0x212   :  { %415 = vsyncpa [#allocation3], 1 }
 0x213   :  { %417 = vsyncpa [#allocation3 + $0x1], 1 }
 0x214   :  { %418 = vsyncpa [#allocation6], 1 }
 0x215   :  { %420 = vsyncpa [#allocation6 + $0x1], 1 }
 0x216   :  { %421 = vsyncpa [#allocation4], 1 }
 0x217   :  { %423 = vsyncpa [#allocation4 + $0x1], 1 }

</bundles_post_ra>
